<compile_context>
chip_gen: v7x
topology: tpu7x:2x2x1
jax: 0.10.0
libtpu: 0.0.40
codegen_flags: <defaults>
</compile_context>

<pallas_src>
import jax
import jax.numpy as jnp
from jax.experimental import pallas as pl
from jax.experimental.pallas import tpu as pltpu


def _mish_kernel(x_ref, o_ref):
    x = x_ref[...].astype(jnp.float32)
    # e = exp(x), clamped so (1+e)^2 never overflows f32 (exp(20)^2 ~ 2.4e17).
    e = jnp.exp(jnp.minimum(x, 20.0))
    num = e * (e + 2.0)                 # (1+e)^2 - 1
    inv = pl.reciprocal(num + 2.0, approx=True)   # 1 / ((1+e)^2 + 1), EUP slot
    y = x * (num * inv)                 # x * tanh(softplus(x))
    # For x > 20, tanh(softplus(x)) == 1 to f32 precision.
    y = jnp.where(x > 20.0, x, y)
    o_ref[...] = y.astype(o_ref.dtype)


def _round_up(a, b):
    return ((a + b - 1) // b) * b


def mish(x, *, target_block_bytes=4 * 1024 * 1024, max_lane_cols=1024):
    """Elementwise Mish on an arbitrarily-shaped array via a Pallas TPU kernel."""
    orig_shape = x.shape
    orig_dtype = x.dtype
    n = x.size
    if n == 0:
        return x

    x_flat = jnp.ravel(x)

    # Lane-dense column count (multiple of 128) that divides n -> free reshape,
    # no whole-array pad/slice copies.  Only pad for a sub-128 remainder.
    cols = max_lane_cols
    while cols > 128 and n % cols != 0:
        cols //= 2
    if n % cols != 0:
        cols = 128
        n_pad = _round_up(n, cols)
        # Rare slow path: element count not a multiple of 128.
        x_flat = jnp.pad(x_flat, (0, n_pad - n))
    else:
        n_pad = n

    rows = n_pad // cols
    x2d = x_flat.reshape(rows, cols)    # contiguous reshape: no data movement

    # ~target_block_bytes per (double-buffered) block; rows multiple of 8.
    itemsize = jnp.dtype(orig_dtype).itemsize
    block_rows = max(8, target_block_bytes // (cols * itemsize))
    block_rows = min(_round_up(block_rows, 8), _round_up(rows, 8))
    grid = (pl.cdiv(rows, block_rows),)

    out2d = pl.pallas_call(
        _mish_kernel,
        out_shape=jax.ShapeDtypeStruct((rows, cols), orig_dtype),
        grid_spec=pltpu.PrefetchScalarGridSpec(
            num_scalar_prefetch=0,
            grid=grid,
            in_specs=[pl.BlockSpec((block_rows, cols), lambda i: (i, 0))],
            out_specs=pl.BlockSpec((block_rows, cols), lambda i: (i, 0)),
        ),
        input_output_aliases={0: 0},
        compiler_params=pltpu.CompilerParams(
            dimension_semantics=("parallel",),
            vmem_limit_bytes=32 * 1024 * 1024,
        ),
    )(x2d)

    if n_pad == n:
        return out2d.reshape(orig_shape)
    return out2d.reshape(-1)[:n].reshape(orig_shape)


def _mish_ref(x):
    xf = x.astype(jnp.float32)
    sp = jnp.maximum(xf, 0.0) + jnp.log1p(jnp.exp(-jnp.abs(xf)))  # stable softplus
    return (xf * jnp.tanh(sp)).astype(x.dtype)


if __name__ == "__main__":
    key = jax.random.PRNGKey(0)
    x = jax.random.normal(key, (2, 4, 16, 16), dtype=jnp.float32)  # NCHW

    y = jax.block_until_ready(mish(x))
    y_ref = _mish_ref(x)

    assert y.shape == x.shape and y.dtype == x.dtype
    # rtol loosened slightly to cover the approx (EUP) reciprocal; error is
    # purely multiplicative in y, so this bound is tight.
    assert jnp.allclose(y, y_ref, rtol=5e-3, atol=1e-5), float(
        jnp.max(jnp.abs(y - y_ref))
    )
    print("KERNEL_OK")
</pallas_src>

<mosaic_0001>
module attributes {stable_mosaic.version = 11 : i64} {
  func.func @_mish_kernel(%arg0: i32, %arg1: memref<8x1024xf32, #tpu.memory_space<vmem>>, %arg2: memref<8x1024xf32, #tpu.memory_space<vmem>>) attributes {dimension_semantics = [#tpu.dimension_semantics<parallel>], iteration_bounds = array<i64: 1>, scalar_prefetch = 0 : i64, scratch_operands = 0 : i64, tpu.core_type = #tpu.core_type<tc>, window_params = [{transform_indices = @transform_0, window_bounds = array<i64: 8, 1024>}, {transform_indices = @transform_1, window_bounds = array<i64: 8, 1024>}]} {
    %c0 = arith.constant 0 : index
    %c0_0 = arith.constant 0 : index
    %0 = vector.load %arg1[%c0, %c0_0] : memref<8x1024xf32, #tpu.memory_space<vmem>>, vector<8x1024xf32>
    %cst = arith.constant 2.000000e+01 : f32
    %1 = vector.broadcast %cst : f32 to vector<8x1024xf32>
    %2 = arith.minimumf %0, %1 : vector<8x1024xf32>
    %3 = math.exp %2 : vector<8x1024xf32>
    %cst_1 = arith.constant 2.000000e+00 : f32
    %4 = vector.broadcast %cst_1 : f32 to vector<8x1024xf32>
    %5 = arith.addf %3, %4 : vector<8x1024xf32>
    %6 = arith.mulf %3, %5 : vector<8x1024xf32>
    %cst_2 = arith.constant 2.000000e+00 : f32
    %7 = vector.broadcast %cst_2 : f32 to vector<8x1024xf32>
    %8 = arith.addf %6, %7 : vector<8x1024xf32>
    %9 = tpu.reciprocal %8 {approx = true} : vector<8x1024xf32> -> vector<8x1024xf32>
    %10 = arith.mulf %6, %9 : vector<8x1024xf32>
    %11 = arith.mulf %0, %10 : vector<8x1024xf32>
    %cst_3 = arith.constant 2.000000e+01 : f32
    %12 = vector.broadcast %cst_3 : f32 to vector<8x1024xf32>
    %13 = arith.cmpf ogt, %0, %12 : vector<8x1024xf32>
    %14 = arith.select %13, %0, %11 : vector<8x1024xi1>, vector<8x1024xf32>
    %c0_4 = arith.constant 0 : index
    %c0_5 = arith.constant 0 : index
    %15 = vector.load %arg2[%c0_4, %c0_5] : memref<8x1024xf32, #tpu.memory_space<vmem>>, vector<8x1024xf32>
    tpu.vector_store %arg2[%c0_4, %c0_5], %14 {strides = array<i32>} : memref<8x1024xf32, #tpu.memory_space<vmem>>, vector<8x1024xf32>,
    return
  }
  func.func @transform_0(%arg0: i32) -> (i32, i32) {
    %c0_i32 = arith.constant 0 : i32
    %c0_i32_0 = arith.constant 0 : i32
    return %arg0, %c0_i32 : i32, i32
  }
  func.func @transform_1(%arg0: i32) -> (i32, i32) {
    %c0_i32 = arith.constant 0 : i32
    %c0_i32_0 = arith.constant 0 : i32
    return %arg0, %c0_i32 : i32, i32
  }
}

</mosaic_0001>

<bundles_post_ra>
// kernel: tpu_custom_call.1
= control target key start
LH: loop header
LB: loop body
LE: loop exit
PB: predicated region body
PF: predicated region fallthrough
CT: control target
= control target key end

     0   :  { %6 = vsyncpa [#allocation3], 0  ;;  %s320_s0 = inlined_call_operand.hbm [shape: f32[2,1024], index: 0, kind: input, shape index: {}, may-alias: {0,1}]   ;;  %s321_s1 = inlined_call_operand.hbm [shape: f32[2,1024], index: 1, kind: output, shape index: {}, may-alias: {0,1}]  }
   0x1   :  { %7 = vsyncpa [#allocation4], 0 }
   0x2   :  { %12 = vsyncadd [#allocation3], 768  ;;  %s228_s6 = smov [#allocation2]   ;;  %s180_s10 = scalar_lea.hbm %s320_s0, 256 }
   0x3   :  { %s13_s7 = sshll.u32 %s228_s6, 4  ;;  %p181_p0 = scmp.ne.s32.totalorder %s320_s0, %s180_s10  ;;  %s14_s7 = int_to_ptr.vmem [resolvable:$true] %s13_s7 }
   0x4   :  { %p184_p1 = scmp.lt.u32.totalorder %s180_s10, %s320_s0 }
   0x6   :  { %p186_p2 = pnand %p184_p1, %p181_p0 }
   0x8   :  { %189 = shalt.err (!%p186_p2)
}
   0x9   :  { %s190_s15 = scalar_lea.vmem %s14_s7, 256  ;;  %s194_s16 = scalar_lea.vmem %s14_s7, 1024 }
   0xa   :  { %p191_p3 = scmp.ne.s32.totalorder %s14_s7, %s190_s15  ;;  %p195_p4 = scmp.lt.s32.totalorder %s14_s7, %s14_s7 }
   0xb   :  { %p196_p5 = scmp.lt.s32.totalorder %s194_s16, %s190_s15 }
   0xd   :  { %p197_p6 = por %p196_p5, %p195_p4 }
   0xf   :  { %p198_p7 = pnand %p197_p6, %p191_p3 }
  0x11   :  { %201 = shalt.err (!%p198_p7)
}
  0x12   :  { %s229_s17 = smov 256   ;;  %s230_s18 = smov 16  }
  0x13   :  { %19 = dma.hbm_to_vmem [thread:$0]  %s320_s0, 256, %s14_s7, [#allocation3], %s229_s17, %s229_s17, %s230_s18  }
  0x14   :  { %224 = dma.done.wait [#allocation3], 1024  }
  0x15   :  { %225 = vsyncadd [#allocation3], 4294966272  ;;  %v257_v0 = vld [vmem:[#allocation2] sm:$0xff]  ;;  %v259_v1 = vld [vmem:[#allocation2 + $0x8] sm:$0xff] }
  0x16   :  { %v261_v2 = vld [vmem:[#allocation2 + $0x10] sm:$0xff]  ;;  %v31_v3 = vmin.f32 %v257_v0, 20.0  ;;  %v32_v4 = vmin.f32 %v259_v1, 20.0  ;;  %v265_v5 = vld [vmem:[#allocation2 + $0x18] sm:$0xff]  ;;  %v267_v6 = vld [vmem:[#allocation2 + $0x20] sm:$0xff]  ;;  %vm103_vm0 = vcmp.gt.f32.partialorder %v257_v0, 20.0 }
  0x17   :  { %v33_v7 = vmin.f32 %v261_v2, 20.0  ;;  %v34_v8 = vmin.f32 %v265_v5, 20.0  ;;  %v271_v9 = vld [vmem:[#allocation2 + $0x28] sm:$0xff]  ;;  %v273_v10 = vld [vmem:[#allocation2 + $0x30] sm:$0xff]  ;;  %v35_v13 = vmin.f32 %v267_v6, 20.0  ;;  %v278_v19 = vld [vmem:[#allocation2 + $0x38] sm:$0xff] }
  0x18   :  { %v39_v11 = vmul.f32 1.442695, %v31_v3  ;;  %v41_v12 = vmul.f32 1.442695, %v32_v4  ;;  %v36_v16 = vmin.f32 %v271_v9, 20.0  ;;  %v37_v18 = vmin.f32 %v273_v10, 20.0 }
  0x19   :  { %v43_v14 = vmul.f32 1.442695, %v33_v7  ;;  %v45_v15 = vmul.f32 1.442695, %v34_v8  ;;  %v47_v17 = vmul.f32 1.442695, %v35_v13 }
  0x1a   :  { %148 = vpow2.f32 %v39_v11  ;;  %v49_v20 = vmul.f32 1.442695, %v36_v16  ;;  %v38_v21 = vmin.f32 %v278_v19, 20.0  ;;  %v51_v22 = vmul.f32 1.442695, %v37_v18 }
  0x1b   :  { %150 = vpow2.f32 %v41_v12  ;;  %vm104_vm1 = vcmp.gt.f32.partialorder %v259_v1, 20.0  ;;  %vm105_vm2 = vcmp.gt.f32.partialorder %v261_v2, 20.0  ;;  %vm106_vm3 = vcmp.gt.f32.partialorder %v265_v5, 20.0 }
  0x1c   :  { %152 = vpow2.f32 %v43_v14  ;;  %v53_v23 = vmul.f32 1.442695, %v38_v21  ;;  %vm107_vm4 = vcmp.gt.f32.partialorder %v267_v6, 20.0  ;;  %vm108_vm5 = vcmp.gt.f32.partialorder %v271_v9, 20.0 }
  0x1d   :  { %154 = vpow2.f32 %v45_v15  ;;  %vm109_vm6 = vcmp.gt.f32.partialorder %v273_v10, 20.0  ;;  %vm110_vm7 = vcmp.gt.f32.partialorder %v278_v19, 20.0 }
  0x1e   :  { %156 = vpow2.f32 %v47_v17 }
  0x1f   :  { %158 = vpow2.f32 %v49_v20 }
  0x20   :  { %160 = vpow2.f32 %v51_v22 }
  0x21   :  { %162 = vpow2.f32 %v53_v23 }
  0x24   :  { %v149_v24 = vpop.eup %148 }
  0x25   :  { %v151_v25 = vpop.eup %150  ;;  %v55_v26 = vadd.f32 2.0, %v149_v24 }
  0x26   :  { %v153_v27 = vpop.eup %152  ;;  %v56_v28 = vadd.f32 2.0, %v151_v25 }
  0x27   :  { %v155_v29 = vpop.eup %154  ;;  %v63_v30 = vmul.f32 %v149_v24, %v55_v26  ;;  %v57_v31 = vadd.f32 2.0, %v153_v27 }
  0x28   :  { %v157_v32 = vpop.eup %156  ;;  %v64_v33 = vmul.f32 %v151_v25, %v56_v28  ;;  %v58_v34 = vadd.f32 2.0, %v155_v29 }
  0x29   :  { %v159_v35 = vpop.eup %158  ;;  %v71_v36 = vadd.f32 2.0, %v63_v30  ;;  %v65_v37 = vmul.f32 %v153_v27, %v57_v31  ;;  %v59_v38 = vadd.f32 2.0, %v157_v32 }
  0x2a   :  { %v161_v39 = vpop.eup %160  ;;  %v72_v40 = vadd.f32 2.0, %v64_v33  ;;  %v66_v41 = vmul.f32 %v155_v29, %v58_v34  ;;  %v60_v42 = vadd.f32 2.0, %v159_v35 }
  0x2b   :  { %v163_v43 = vpop.eup %162  ;;  %164 = vrcp.f32 %v71_v36  ;;  %v73_v44 = vadd.f32 2.0, %v65_v37  ;;  %v67_v45 = vmul.f32 %v157_v32, %v59_v38  ;;  %v61_v46 = vadd.f32 2.0, %v161_v39 }
  0x2c   :  { %166 = vrcp.f32 %v72_v40  ;;  %v74_v47 = vadd.f32 2.0, %v66_v41  ;;  %v68_v48 = vmul.f32 %v159_v35, %v60_v42  ;;  %v62_v49 = vadd.f32 2.0, %v163_v43 }
  0x2d   :  { %168 = vrcp.f32 %v73_v44  ;;  %v75_v50 = vadd.f32 2.0, %v67_v45  ;;  %v69_v51 = vmul.f32 %v161_v39, %v61_v46 }
  0x2e   :  { %170 = vrcp.f32 %v74_v47  ;;  %v76_v52 = vadd.f32 2.0, %v68_v48  ;;  %v70_v53 = vmul.f32 %v163_v43, %v62_v49 }
  0x2f   :  { %172 = vrcp.f32 %v75_v50  ;;  %v77_v54 = vadd.f32 2.0, %v69_v51 }
  0x30   :  { %174 = vrcp.f32 %v76_v52  ;;  %v78_v55 = vadd.f32 2.0, %v70_v53 }
  0x31   :  { %176 = vrcp.f32 %v77_v54 }
  0x32   :  { %178 = vrcp.f32 %v78_v55 }
  0x35   :  { %v165_v56 = vpop.eup %164 }
  0x36   :  { %v167_v57 = vpop.eup %166  ;;  %v87_v58 = vmul.f32 %v165_v56, %v63_v30 }
  0x37   :  { %v169_v59 = vpop.eup %168  ;;  %v88_v60 = vmul.f32 %v167_v57, %v64_v33 }
  0x38   :  { %v171_v61 = vpop.eup %170  ;;  %v95_v62 = vmul.f32 %v87_v58, %v257_v0  ;;  %v89_v63 = vmul.f32 %v169_v59, %v65_v37 }
  0x39   :  { %v173_v3 = vpop.eup %172  ;;  %v96_v4 = vmul.f32 %v88_v60, %v259_v1  ;;  %v90_v7 = vmul.f32 %v171_v61, %v66_v41 }
  0x3a   :  { %v175_v8 = vpop.eup %174  ;;  %v111_v11 = vsel %vm103_vm0, %v257_v0, %v95_v62  ;;  %v97_v12 = vmul.f32 %v89_v63, %v261_v2  ;;  %v91_v13 = vmul.f32 %v173_v3, %v67_v45 }
  0x3b   :  { %v177_v14 = vpop.eup %176  ;;  %119 = vst [vmem:[#allocation5] sm:$0xff] %v111_v11  ;;  %v112_v15 = vsel %vm104_vm1, %v259_v1, %v96_v4  ;;  %v98_v16 = vmul.f32 %v90_v7, %v265_v5  ;;  %v92_v17 = vmul.f32 %v175_v8, %v68_v48 }
  0x3c   :  { %v179_v18 = vpop.eup %178  ;;  %120 = vst [vmem:[#allocation5 + $0x8] sm:$0xff] %v112_v15  ;;  %v113_v20 = vsel %vm105_vm2, %v261_v2, %v97_v12  ;;  %v99_v0 = vmul.f32 %v91_v13, %v267_v6  ;;  %v93_v21 = vmul.f32 %v177_v14, %v69_v51 }
  0x3d   :  { %121 = vst [vmem:[#allocation5 + $0x10] sm:$0xff] %v113_v20  ;;  %v114_v22 = vsel %vm106_vm3, %v265_v5, %v98_v16  ;;  %v100_v23 = vmul.f32 %v92_v17, %v271_v9  ;;  %v94_v1 = vmul.f32 %v179_v18, %v70_v53 }
  0x3e   :  { %122 = vst [vmem:[#allocation5 + $0x18] sm:$0xff] %v114_v22  ;;  %v115_v24 = vsel %vm107_vm4, %v267_v6, %v99_v0  ;;  %v101_v25 = vmul.f32 %v93_v21, %v273_v10 }
  0x3f   :  { %123 = vst [vmem:[#allocation5 + $0x20] sm:$0xff] %v115_v24  ;;  %v116_v2 = vsel %vm108_vm5, %v271_v9, %v100_v23  ;;  %v102_v26 = vmul.f32 %v94_v1, %v278_v19 }
  0x40   :  { %124 = vst [vmem:[#allocation5 + $0x28] sm:$0xff] %v116_v2  ;;  %v117_v5 = vsel %vm109_vm6, %v273_v10, %v101_v25 }
  0x41   :  { %125 = vst [vmem:[#allocation5 + $0x30] sm:$0xff] %v117_v5  ;;  %v118_v27 = vsel %vm110_vm7, %v278_v19, %v102_v26 }
  0x42   :  { %126 = vst [vmem:[#allocation5 + $0x38] sm:$0xff] %v118_v27 }
  0x43   :  { %131 = vsyncadd [#allocation4], 768  ;;  %s231_s0 = smov [#allocation5]  }
  0x44   :  { %s132_s21 = sshll.u32 %s231_s0, 4  ;;  %s133_s21 = int_to_ptr.vmem [resolvable:$true] %s132_s21 }
  0x45   :  { %s202_s22 = scalar_lea.vmem %s133_s21, 256  ;;  %s206_s23 = scalar_lea.vmem %s133_s21, 1024 }
  0x46   :  { %p203_p8 = scmp.ne.s32.totalorder %s133_s21, %s202_s22  ;;  %p207_p9 = scmp.lt.s32.totalorder %s133_s21, %s133_s21 }
  0x47   :  { %p208_p10 = scmp.lt.s32.totalorder %s206_s23, %s202_s22 }
  0x49   :  { %p209_p11 = por %p208_p10, %p207_p9 }
  0x4b   :  { %p210_p12 = pnand %p209_p11, %p203_p8 }
  0x4d   :  { %213 = shalt.err (!%p210_p12)
}
  0x4e   :  { %s214_s26 = scalar_lea.hbm %s321_s1, 256 }
  0x4f   :  { %p215_p13 = scmp.ne.s32.totalorder %s321_s1, %s214_s26  ;;  %p218_p0 = scmp.lt.u32.totalorder %s214_s26, %s321_s1 }
  0x51   :  { %p220_p1 = pnand %p218_p0, %p215_p13 }
  0x53   :  { %223 = shalt.err (!%p220_p1)
}
  0x54   :  { %138 = dma.vmem_to_hbm [thread:$0]  %s133_s21, 256, %s321_s1, [#allocation4], %s229_s17, %s229_s17, %s230_s18  }
  0x55   :  { %226 = dma.done.wait [#allocation4], 1024  }
  0x56   :  { %227 = vsyncadd [#allocation4], 4294966272 }
  0x57   :  { %142 = vsyncpa [#allocation3], 1 }
  0x58   :  { %143 = vsyncpa [#allocation4], 1 }

</bundles_post_ra>
